<compile_context>
chip_gen: v6e
topology: v6e:2x2x1
jax: 0.10.0
libtpu: 0.0.40
codegen_flags: <defaults>
</compile_context>

<pallas_src>
import jax
import jax.numpy as jnp
from jax.experimental import pallas as pl
from jax.experimental.pallas import tpu as pltpu

_MAX_LANES = 2048                 # cap on lane width of the (rows, lanes) view
_XLA_BYPASS_BYTES = 64 * 1024     # below this, pallas launch overhead dominates


def glu_kernel(a_ref, b_ref, o_ref):
    # a_ref / b_ref / o_ref: (TR, L) lane-dense tiles in VMEM.
    o_ref[...] = (a_ref[...] * jax.nn.sigmoid(b_ref[...])).astype(o_ref.dtype)


def _cdiv(a, b):
    return -(-a // b)


def _round_up(x, m):
    return ((x + m - 1) // m) * m


def _sublane_granule(dtype):
    # Min sublane tile: 8 rows for 4-byte dtypes, 16 for bf16/fp16, 32 for 8-bit.
    itemsize = jnp.dtype(dtype).itemsize
    return max(8, 32 // max(1, itemsize))


def _vmem_capacity_bytes():
    # Generation-aware VMEM budget; conservative 64 MiB (v7x) fallback.
    try:
        return int(pltpu.get_tpu_info().vmem_capacity_bytes)
    except Exception:
        return 64 * 1024 * 1024


def _pick_lane_width(flat):
    """Largest multiple of 128 (<= _MAX_LANES) that divides `flat`, else 0."""
    for cand in range(_MAX_LANES, 127, -128):
        if flat % cand == 0:
            return cand
    return 0


def glu(x, *, force_pallas=False):
    """x: (B, C, H, W) with C even -> (B, C//2, H, W)."""
    B, C, H, W = x.shape
    assert C % 2 == 0, "channels dont divide 2!"
    nc = C // 2
    hw = H * W
    flat = nc * hw                      # elements per (batch, half)
    dtype = x.dtype
    elem_bytes = jnp.dtype(dtype).itemsize

    # Tiny activations: pallas_call fixed launch + pipeline prologue dominates;
    # XLA's fused elementwise is strictly faster on every generation.
    if not force_pallas and x.size * elem_bytes < _XLA_BYPASS_BYTES:
        return x[:, :nc] * jax.nn.sigmoid(x[:, nc:])

    # --- Generation-aware sizing ------------------------------------------------
    vmem_cap = _vmem_capacity_bytes()
    vmem_limit = (vmem_cap * 7) // 8          # ~56 MiB on v7x, ~112 MiB on v5e/v6e
    tile_bytes = vmem_cap // 12               # 3 streams x double-buffer ~= 50% VMEM

    granule = _sublane_granule(dtype)

    # --- Lane-dense (R, L) view of each half -------------------------------------
    L = _pick_lane_width(flat)
    padded = False
    flat_pad = flat
    if L == 0:
        # flat not divisible by 128: pad the per-half flat payload to a multiple
        # of 128 so stores stay unmasked.  One extra HBM copy, fallback path only.
        flat_pad = _round_up(flat, 128)
        L = _pick_lane_width(flat_pad)
        xv = jnp.pad(x.reshape(B, 2, flat), ((0, 0), (0, 0), (0, flat_pad - flat)))
        R = flat_pad // L
        xv = xv.reshape(B, 2, R, L)
        padded = True
    else:
        R = flat // L
        xv = x.reshape(B, 2, R, L)            # free view of contiguous NCHW

    # --- cdiv-based row tiling ----------------------------------------------------
    row_cap = max(granule, (tile_bytes // (L * elem_bytes)) // granule * granule)
    TR = min(R, row_cap)
    if TR < R:
        TR = max(granule, (TR // granule) * granule)
    num_row_tiles = _cdiv(R, TR)

    # Megacore balance (v7x): aim for >= 4 total grid steps so both TCs stay busy.
    if B * num_row_tiles < 4 and TR > granule:
        want = _cdiv(4, B)
        TR = max(granule, (R // want) // granule * granule)
        num_row_tiles = _cdiv(R, TR)

    grid = (B, num_row_tiles)
    blk_in = (pl.Squeezed(), pl.Squeezed(), TR, L)

    out = pl.pallas_call(
        glu_kernel,
        out_shape=jax.ShapeDtypeStruct((B, R, L), dtype),
        grid=grid,
        in_specs=[
            pl.BlockSpec(blk_in, lambda b, t: (b, 0, t, 0)),   # first channel half
            pl.BlockSpec(blk_in, lambda b, t: (b, 1, t, 0)),   # second channel half
        ],
        out_specs=pl.BlockSpec((pl.Squeezed(), TR, L), lambda b, t: (b, t, 0)),
        compiler_params=pltpu.CompilerParams(
            dimension_semantics=("parallel", "parallel"),
            vmem_limit_bytes=vmem_limit,
        ),
    )(xv, xv)

    if padded:
        out = out.reshape(B, flat_pad)[:, :flat]
    return out.reshape(B, nc, H, W)


if __name__ == "__main__":
    key = jax.random.PRNGKey(0)
    k1, k2, k3 = jax.random.split(key, 3)

    def ref_glu(x):
        nc = x.shape[1] // 2
        return x[:, :nc] * jax.nn.sigmoid(x[:, nc:])

    # 1) Tiny spec-consistent shape: auto path (XLA bypass), checks wrapper semantics.
    x0 = jax.random.normal(k1, (2, 4, 16, 16), dtype=jnp.float32)
    y0 = jax.block_until_ready(glu(x0))
    assert y0.shape == (2, 2, 16, 16)
    assert jnp.allclose(y0, ref_glu(x0), atol=1e-6, rtol=1e-6)

    # 2) f32 shape large enough to take the Pallas path (lane-dense, no padding).
    x1 = jax.random.normal(k2, (2, 8, 32, 128), dtype=jnp.float32)
    y1 = jax.block_until_ready(glu(x1))
    assert jnp.allclose(y1, ref_glu(x1), atol=1e-6, rtol=1e-6)

    # 3) bf16 Pallas path (16-row sublane granule, >=4-step megacore heuristic).
    x2 = jax.random.normal(k3, (1, 32, 64, 128), dtype=jnp.bfloat16)
    y2 = jax.block_until_ready(glu(x2))
    assert jnp.allclose(y2.astype(jnp.float32), ref_glu(x2).astype(jnp.float32),
                        atol=2e-2, rtol=2e-2)

    # 4) flat % 128 != 0 fallback (wrapper-side lane padding), forced through Pallas.
    x3 = jax.random.normal(k1, (2, 8, 15, 15), dtype=jnp.float32)
    y3 = jax.block_until_ready(glu(x3, force_pallas=True))
    assert jnp.allclose(y3, ref_glu(x3), atol=1e-6, rtol=1e-6)

    print("KERNEL_OK")
</pallas_src>

<mosaic_0001>
module attributes {stable_mosaic.version = 11 : i64} {
  func.func @glu_kernel(%arg0: i32, %arg1: i32, %arg2: memref<1x1x8x2048xf32, #tpu.memory_space<vmem>>, %arg3: memref<1x1x8x2048xf32, #tpu.memory_space<vmem>>, %arg4: memref<1x8x2048xf32, #tpu.memory_space<vmem>>) attributes {dimension_semantics = [#tpu.dimension_semantics<parallel>, #tpu.dimension_semantics<parallel>], iteration_bounds = array<i64: 2, 1>, scalar_prefetch = 0 : i64, scratch_operands = 0 : i64, tpu.core_type = #tpu.core_type<tc>, window_params = [{transform_indices = @transform_0, window_bounds = array<i64: 1, 1, 8, 2048>}, {transform_indices = @transform_1, window_bounds = array<i64: 1, 1, 8, 2048>}, {transform_indices = @transform_2, window_bounds = array<i64: 1, 8, 2048>}]} {
    %c0 = arith.constant 0 : index
    %c0_0 = arith.constant 0 : index
    %c0_1 = arith.constant 0 : index
    %c0_2 = arith.constant 0 : index
    %0 = vector.load %arg2[%c0, %c0_0, %c0_1, %c0_2] : memref<1x1x8x2048xf32, #tpu.memory_space<vmem>>, vector<1x1x8x2048xf32>
    %1 = vector.shape_cast %0 : vector<1x1x8x2048xf32> to vector<8x2048xf32>
    %c0_3 = arith.constant 0 : index
    %c0_4 = arith.constant 0 : index
    %c0_5 = arith.constant 0 : index
    %c0_6 = arith.constant 0 : index
    %2 = vector.load %arg3[%c0_3, %c0_4, %c0_5, %c0_6] : memref<1x1x8x2048xf32, #tpu.memory_space<vmem>>, vector<1x1x8x2048xf32>
    %3 = vector.shape_cast %2 : vector<1x1x8x2048xf32> to vector<8x2048xf32>
    %4 = arith.negf %3 : vector<8x2048xf32>
    %5 = math.exp %4 : vector<8x2048xf32>
    %cst = arith.constant 1.000000e+00 : f32
    %6 = vector.broadcast %cst : f32 to vector<8x2048xf32>
    %7 = arith.addf %6, %5 : vector<8x2048xf32>
    %8 = arith.divf %6, %7 : vector<8x2048xf32>
    %9 = arith.mulf %1, %8 : vector<8x2048xf32>
    %c0_7 = arith.constant 0 : index
    %c0_8 = arith.constant 0 : index
    %c0_9 = arith.constant 0 : index
    %10 = vector.load %arg4[%c0_7, %c0_8, %c0_9] : memref<1x8x2048xf32, #tpu.memory_space<vmem>>, vector<1x8x2048xf32>
    %11 = vector.shape_cast %10 : vector<1x8x2048xf32> to vector<8x2048xf32>
    %12 = vector.shape_cast %9 : vector<8x2048xf32> to vector<1x8x2048xf32>
    tpu.vector_store %arg4[%c0_7, %c0_8, %c0_9], %12 {strides = array<i32>} : memref<1x8x2048xf32, #tpu.memory_space<vmem>>, vector<1x8x2048xf32>,
    return
  }
  func.func @transform_0(%arg0: i32, %arg1: i32) -> (i32, i32, i32, i32) {
    %c0_i32 = arith.constant 0 : i32
    %c0_i32_0 = arith.constant 0 : i32
    %c0_i32_1 = arith.constant 0 : i32
    return %arg0, %c0_i32, %arg1, %c0_i32_0 : i32, i32, i32, i32
  }
  func.func @transform_1(%arg0: i32, %arg1: i32) -> (i32, i32, i32, i32) {
    %c1_i32 = arith.constant 1 : i32
    %c0_i32 = arith.constant 0 : i32
    %c0_i32_0 = arith.constant 0 : i32
    return %arg0, %c1_i32, %arg1, %c0_i32 : i32, i32, i32, i32
  }
  func.func @transform_2(%arg0: i32, %arg1: i32) -> (i32, i32, i32) {
    %c0_i32 = arith.constant 0 : i32
    %c0_i32_0 = arith.constant 0 : i32
    return %arg0, %arg1, %c0_i32 : i32, i32, i32
  }
}

</mosaic_0001>

<bundles_post_ra>
// kernel: tpu_custom_call.1
= control target key start
LH: loop header
LB: loop body
LE: loop exit
PB: predicated region body
PF: predicated region fallthrough
CT: control target
= control target key end

     0   :  { %7 = vsyncpa [#allocation3], 0  ;;  %s1066_s0 = inlined_call_operand.hbm [shape: f32[2,2,8,2048], index: 0, kind: input, shape index: {}]   ;;  %s1067_s1 = inlined_call_operand.hbm [shape: f32[2,2,8,2048], index: 1, kind: input, shape index: {}]   ;;  %s1068_s2 = inlined_call_operand.hbm [shape: f32[2,8,2048], index: 2, kind: output, shape index: {}]  }
   0x1   :  { %9 = vsyncpa [#allocation3 + $0x1], 0 }
   0x2   :  { %10 = vsyncpa [#allocation6], 0 }
   0x3   :  { %12 = vsyncpa [#allocation6 + $0x1], 0 }
   0x4   :  { %13 = vsyncpa [#allocation4], 0 }
   0x5   :  { %15 = vsyncpa [#allocation4 + $0x1], 0  ;;  %s839_s9 = smov 0   ;;  %s841_s10 = smov 0  }
   0x6   :  { %s843_s11 = smov 0   ;;  %s845_s12 = smov 0  }
   0x7   :  { %s847_s13 = smov 0   ;;  %s849_s14 = smov 0  }
   0x8 LB: > { %s509_s15 = sadd.s32 4294967295, %s819_s14   ;;  %s510_s16 = sadd.s32 4294967294, %s819_s14   ;;  %s819_s14 = sphi %s849_s14, %s21_s14   ;;  %s815_s13 = sphi %s847_s13, %s1080_s13   ;;  %s811_s12 = sphi %s845_s12, %s1079_s12   ;;  %s807_s11 = sphi %s843_s11, %s1078_s11   ;;  %s803_s10 = sphi %s841_s10, %s1077_s10   ;;  %s799_s9 = sphi %s839_s9, %s1076_s9  }
   0x9   : > { %s33_s17 = sadd.s32 1, %s815_s13  ;;  %s42_s18 = sadd.s32 1, %s807_s11 }
   0xa   : > { %p35_p0 = scmp.ge.s32.totalorder %s33_s17, 2  ;;  %p49_p1 = scmp.ne.s32.totalorder %s807_s11, %s803_s10 }
   0xb   : > { %p50_p2 = scmp.eq.s32.totalorder %s819_s14, 0  ;;  %p55_p3 = scmp.ne.s32.totalorder %s803_s10, %s799_s9 }
   0xc   : > { %s1082_s17 = smov (%p35_p0, %s33_s17), 0  ;;  %p56_p5 = scmp.eq.s32.totalorder %s509_s15, 0 }
   0xd   : > { %p880_p4 = por %p50_p2, %p49_p1  ;;  %s37_s20 = ssub.s32 %s815_s13, %s1082_s17 }
   0xe   : > { %p109_p6 = scmp.eq.s32.totalorder %s509_s15, 1  ;;  %p40_p7 = scmp.eq.s32.totalorder %s37_s20, 0 }
   0xf   : > { %p886_p8 = por %p56_p5, %p55_p3  ;;  %p115_p10 = scmp.eq.s32.totalorder %s510_s16, 1 }
  0x10   : > { %p890_p9 = por %p109_p6, %p49_p1  ;;  %p564_p13 = scmp.lt.s32.totalorder %s819_s14, 2 }
  0x11   : > { %s895_s23 = scalar_select %p40_p7, %s807_s11, %s42_s18  }
  0x12   : > { %p897_p11 = por %p115_p10, %p55_p3  ;;  %s904_s25 = sand.u32 1, %s807_s11  }
  0x13   : > { %s513_s26 = sshll.u32 %s904_s25, 7  ;;  %s544_s27 = sshll.u32 %s815_s13, 12 }
  0x14   : > { %s147_s30 = scalar_lea.hbm %s1066_s0, %s544_s27  ;;  %s139_s3 = scalar_lea.vmem [#allocation2], %s513_s26 }
  0x15   : > { %s149_s4 = sshll.u32 %s139_s3, 4  ;;  %p913_p0 = pnand %p564_p13, %p880_p4  ;;  %s150_s4 = int_to_ptr.vmem [resolvable:$true] %s149_s4 }
  0x16   : > { %p519_p1 = scmp.ge.s32.totalorder %s819_s14, 1  ;;  %p176_p2 = scmp.lt.s32.totalorder %s819_s14, 3 }
  0x17   : > { %s136_s6 = scalar_lea.sflag [#allocation3], %s904_s25  ;;  %p680_p3 = pneg %p913_p0 }
  0x18   : > { %s691_s7 = scalar_lea.vmem %s150_s4, 2048  ;;  %s821_s8 = smov [#allocation2]  }
  0x19   : > { %p692_p5 = scmp.ne.s32.totalorder %s150_s4, %s691_s7  ;;  %s696_s15 = sshll.u32 %s821_s8, 4  ;;  %s697_s15 = int_to_ptr.vmem [resolvable:$false] %s696_s15 }
  0x1a   : > { %s698_s16 = scalar_lea.vmem %s697_s15, 4096  ;;  %p699_p4 = scmp.lt.s32.totalorder %s150_s4, %s697_s15 }
  0x1b   : > { %p694_p6 = pnand %p692_p5, %p680_p3  ;;  %p700_p10 = scmp.lt.s32.totalorder %s698_s16, %s691_s7 }
  0x1d   : > { %p695_p7 = pneg %p694_p6  ;;  %p701_p13 = por %p700_p10, %p699_p4 }
  0x1f   : > { %p702_p12 = pnand %p701_p13, %p695_p7 }
  0x21   : > { %705 = shalt.err (!%p702_p12)
}
  0x22   : > { %556 = dma.hbm_to_vmem [thread:$0]  (!%p913_p0), %s147_s30, 2048, %s150_s4, %s136_s6  }
  0x23   : > { %p931_p5 = pnand %p519_p1, %p176_p2  ;;  %s440_s28 = scalar_lea.hbm %s1067_s1, %s544_s27 }
  0x24   : > { %s160_s29 = scalar_lea.vmem [#allocation5], %s513_s26  ;;  %s441_s7 = scalar_lea.hbm %s440_s28, 2048 }
  0x25   : > { %s171_s3 = sshll.u32 %s160_s29, 4  ;;  %s157_s8 = scalar_lea.sflag [#allocation6], %s904_s25  ;;  %s172_s3 = int_to_ptr.vmem [resolvable:$true] %s171_s3 }
  0x26   : > { %s719_s15 = scalar_lea.vmem %s172_s3, 2048  ;;  %s822_s30 = smov [#allocation5]  }
  0x27   : > { %p720_p12 = scmp.ne.s32.totalorder %s172_s3, %s719_s15  ;;  %s724_s4 = sshll.u32 %s822_s30, 4  ;;  %s725_s4 = int_to_ptr.vmem [resolvable:$false] %s724_s4 }
  0x28   : > { %s726_s6 = scalar_lea.vmem %s725_s4, 4096  ;;  %p727_p1 = scmp.lt.s32.totalorder %s172_s3, %s725_s4 }
  0x29   : > { %p722_p6 = pnand %p720_p12, %p680_p3  ;;  %p728_p2 = scmp.lt.s32.totalorder %s726_s6, %s719_s15 }
  0x2b   : > { %p723_p7 = pneg %p722_p6  ;;  %p729_p4 = por %p728_p2, %p727_p1 }
  0x2d   : > { %p730_p10 = pnand %p729_p4, %p723_p7 }
  0x2f   : > { %733 = shalt.err (!%p730_p10)
}
  0x30   : > { %559 = dma.hbm_to_vmem [thread:$0]  (!%p913_p0), %s441_s7, 2048, %s172_s3, %s157_s8  }
  0x31   : > { %180 = sbr.rel (%p931_p5) target bundleno = 120 (0x78), region = 28  ;;  %s947_s25 = sand.u32 (!%p931_p5), 1, %s803_s10  }
  0x32   : > { %s950_s26 = sshll.u32 (!%p931_p5), %s947_s25, 7  ;;  %s183_s27 = scalar_lea.sflag (!%p931_p5), [#allocation3], %s947_s25 }
  0x33   : > { %s954_s16 = scalar_lea.vmem (!%p931_p5), [#allocation2], %s950_s26 }
  0x36   : > { %786 = dma.done.wait (%p886_p8), %s183_s27, 2048  }
  0x37   : > { %788 = vsyncadd (%p886_p8), %s183_s27, 4294965248  ;;  %s192_s5 = scalar_lea.sflag [#allocation6], %s947_s25  ;;  %s962_s18 = scalar_lea.vmem [#allocation5], %s950_s26 }
  0x38   : > { %790 = dma.done.wait (%p886_p8), %s192_s5, 2048  }
  0x39   : > { %792 = vsyncadd (%p886_p8), %s192_s5, 4294965248  ;;  %v237_v0 = vld [vmem:[%s962_s18] sm:$0xff]  ;;  %v238_v2 = vld [vmem:[%s962_s18 + $0x8] sm:$0xff]  ;;  %s990_s21 = scalar_lea.vmem [#allocation7], %s950_s26  ;;  %s546_s19 = sshll.u32 %s811_s12, 11 }
  0x3a   : > { %v523_v1 = vmul.f32 -1.442695, %v237_v0  ;;  %v239_v3 = vld [vmem:[%s962_s18 + $0x10] sm:$0xff]  ;;  %v524_v4 = vmul.f32 -1.442695, %v238_v2  ;;  %v240_v6 = vld [vmem:[%s962_s18 + $0x18] sm:$0xff]  ;;  %s1022_s3 = scalar_lea.hbm %s1068_s2, %s546_s19 }
  0x3b   : > { %v525_v5 = vmul.f32 -1.442695, %v239_v3  ;;  %v526_v7 = vmul.f32 -1.442695, %v240_v6  ;;  %v241_v8 = vld [vmem:[%s962_s18 + $0x20] sm:$0xff]  ;;  %v242_v10 = vld [vmem:[%s962_s18 + $0x28] sm:$0xff] }
  0x3c   : > { %614 = vpow2.f32 %v523_v1  ;;  %v527_v9 = vmul.f32 -1.442695, %v241_v8  ;;  %v243_v11 = vld [vmem:[%s962_s18 + $0x30] sm:$0xff]  ;;  %v528_v12 = vmul.f32 -1.442695, %v242_v10  ;;  %v244_v14 = vld [vmem:[%s962_s18 + $0x38] sm:$0xff] }
  0x3d   : > { %616 = vpow2.f32 %v524_v4  ;;  %v529_v13 = vmul.f32 -1.442695, %v243_v11  ;;  %v530_v15 = vmul.f32 -1.442695, %v244_v14  ;;  %v245_v16 = vld [vmem:[%s962_s18 + $0x40] sm:$0xff]  ;;  %v246_v18 = vld [vmem:[%s962_s18 + $0x48] sm:$0xff] }
  0x3e   : > { %618 = vpow2.f32 %v525_v5  ;;  %v531_v17 = vmul.f32 -1.442695, %v245_v16  ;;  %v247_v19 = vld [vmem:[%s962_s18 + $0x50] sm:$0xff]  ;;  %v532_v20 = vmul.f32 -1.442695, %v246_v18  ;;  %v248_v21 = vld [vmem:[%s962_s18 + $0x58] sm:$0xff] }
  0x3f   : > { %620 = vpow2.f32 %v526_v7  ;;  %v533_v22 = vmul.f32 -1.442695, %v247_v19  ;;  %v249_v23 = vld [vmem:[%s962_s18 + $0x60] sm:$0xff]  ;;  %v534_v24 = vmul.f32 -1.442695, %v248_v21  ;;  %v250_v25 = vld [vmem:[%s962_s18 + $0x68] sm:$0xff] }
  0x40   : > { %622 = vpow2.f32 %v527_v9  ;;  %v251_v26 = vld [vmem:[%s962_s18 + $0x70] sm:$0xff]  ;;  %v535_v27 = vmul.f32 -1.442695, %v249_v23  ;;  %v252_v28 = vld [vmem:[%s962_s18 + $0x78] sm:$0xff]  ;;  %v536_v29 = vmul.f32 -1.442695, %v250_v25 }
  0x41   : > { %624 = vpow2.f32 %v528_v12  ;;  %v537_v30 = vmul.f32 -1.442695, %v251_v26  ;;  %v538_v31 = vmul.f32 -1.442695, %v252_v28  ;;  %v221_v60 = vld [vmem:[%s954_s16] sm:$0xff]  ;;  %v222_v63 = vld [vmem:[%s954_s16 + $0x8] sm:$0xff] }
  0x42   : > { %626 = vpow2.f32 %v529_v13  ;;  %v223_v2 = vld [vmem:[%s954_s16 + $0x10] sm:$0xff]  ;;  %v224_v6 = vld [vmem:[%s954_s16 + $0x18] sm:$0xff]  ;;  %v225_v9 = vld [vmem:[%s954_s16 + $0x20] sm:$0xff]  ;;  %s398_s20 = sshll.u32 %s990_s21, 4  ;;  %s382_s7 = scalar_lea.sflag [#allocation4], %s947_s25  ;;  %s399_s20 = int_to_ptr.vmem [resolvable:$true] %s398_s20 }
  0x43   : > { %628 = vpow2.f32 %v530_v15  ;;  %v226_v12 = vld [vmem:[%s954_s16 + $0x28] sm:$0xff]  ;;  %v227_v15 = vld [vmem:[%s954_s16 + $0x30] sm:$0xff]  ;;  %v228_v18 = vld [vmem:[%s954_s16 + $0x38] sm:$0xff]  ;;  %s735_s12 = scalar_lea.vmem %s399_s20, 2048  ;;  %s823_s8 = smov [#allocation7]  }
  0x44   : > { %630 = vpow2.f32 %v531_v17  ;;  %v229_v21 = vld [vmem:[%s954_s16 + $0x40] sm:$0xff]  ;;  %p736_p8 = scmp.ne.s32.totalorder %s399_s20, %s735_s12  ;;  %s739_s15 = sshll.u32 %s823_s8, 4  ;;  %s740_s15 = int_to_ptr.vmem [resolvable:$false] %s739_s15 }
  0x45   : > { %632 = vpow2.f32 %v532_v20  ;;  %s741_s30 = scalar_lea.vmem %s740_s15, 4096  ;;  %p742_p13 = scmp.lt.s32.totalorder %s399_s20, %s740_s15 }
  0x46   : > { %634 = vpow2.f32 %v533_v22  ;;  %p737_p0 = pnand %p736_p8, %p890_p9  ;;  %p743_p5 = scmp.lt.s32.totalorder %s741_s30, %s735_s12 }
  0x47   : > { %636 = vpow2.f32 %v534_v24  ;;  %v230_v24 = vld [vmem:[%s954_s16 + $0x48] sm:$0xff] }
  0x48   : > { %638 = vpow2.f32 %v535_v27  ;;  %v231_v27 = vld [vmem:[%s954_s16 + $0x50] sm:$0xff]  ;;  %p738_p3 = pneg %p737_p0  ;;  %p744_p12 = por %p743_p5, %p742_p13 }
  0x49   : > { %v615_v32 = vpop.eup %614  ;;  %640 = vpow2.f32 %v536_v29 }
  0x4a   : > { %v617_v33 = vpop.eup %616  ;;  %v301_v34 = vadd.f32 1.0, %v615_v32  ;;  %642 = vpow2.f32 %v537_v30  ;;  %v232_v30 = vld [vmem:[%s954_s16 + $0x58] sm:$0xff]  ;;  %p745_p6 = pnand %p744_p12, %p738_p3 }
  0x4b   : > { %v619_v35 = vpop.eup %618  ;;  %v302_v36 = vadd.f32 1.0, %v617_v33  ;;  %644 = vpow2.f32 %v538_v31  ;;  %v233_v33 = vld [vmem:[%s954_s16 + $0x60] sm:$0xff] }
  0x4c   : > { %v621_v37 = vpop.eup %620  ;;  %646 = vrcp.f32 %v301_v34  ;;  %v303_v38 = vadd.f32 1.0, %v619_v35 }
  0x4d   : > { %v623_v39 = vpop.eup %622  ;;  %648 = vrcp.f32 %v302_v36  ;;  %v304_v40 = vadd.f32 1.0, %v621_v37  ;;  %v234_v36 = vld [vmem:[%s954_s16 + $0x68] sm:$0xff] }
  0x4e   : > { %v625_v41 = vpop.eup %624  ;;  %650 = vrcp.f32 %v303_v38  ;;  %v305_v42 = vadd.f32 1.0, %v623_v39  ;;  %v235_v39 = vld [vmem:[%s954_s16 + $0x70] sm:$0xff] }
  0x4f   : > { %v627_v43 = vpop.eup %626  ;;  %652 = vrcp.f32 %v304_v40  ;;  %v306_v44 = vadd.f32 1.0, %v625_v41 }
  0x50   : > { %v629_v45 = vpop.eup %628  ;;  %654 = vrcp.f32 %v305_v42  ;;  %v307_v46 = vadd.f32 1.0, %v627_v43  ;;  %v236_v42 = vld [vmem:[%s954_s16 + $0x78] sm:$0xff] }
  0x51   : > { %v631_v47 = vpop.eup %630  ;;  %656 = vrcp.f32 %v306_v44  ;;  %v308_v48 = vadd.f32 1.0, %v629_v45 }
  0x52   : > { %v633_v49 = vpop.eup %632  ;;  %658 = vrcp.f32 %v307_v46  ;;  %v309_v50 = vadd.f32 1.0, %v631_v47 }
  0x53   : > { %v635_v51 = vpop.eup %634  ;;  %660 = vrcp.f32 %v308_v48  ;;  %v310_v52 = vadd.f32 1.0, %v633_v49 }
  0x54   : > { %v637_v53 = vpop.eup %636  ;;  %662 = vrcp.f32 %v309_v50  ;;  %v311_v54 = vadd.f32 1.0, %v635_v51 }
  0x55   : > { %v639_v55 = vpop.eup %638  ;;  %664 = vrcp.f32 %v310_v52  ;;  %v312_v56 = vadd.f32 1.0, %v637_v53 }
  0x56   : > { %v641_v57 = vpop.eup %640  ;;  %666 = vrcp.f32 %v311_v54  ;;  %v313_v58 = vadd.f32 1.0, %v639_v55 }
  0x57   : > { %v643_v59 = vpop.eup %642  ;;  %668 = vrcp.f32 %v312_v56  ;;  %v314_v61 = vadd.f32 1.0, %v641_v57 }
  0x58   : > { %v645_v62 = vpop.eup %644  ;;  %670 = vrcp.f32 %v313_v58  ;;  %v315_v0 = vadd.f32 1.0, %v643_v59 }
  0x59   : > { %v647_v1 = vpop.eup %646  ;;  %672 = vrcp.f32 %v314_v61  ;;  %v316_v3 = vadd.f32 1.0, %v645_v62 }
  0x5a   : > { %v649_v4 = vpop.eup %648  ;;  %v349_v5 = vmul.f32 %v647_v1, %v221_v60  ;;  %674 = vrcp.f32 %v315_v0 }
  0x5b   : > { %v651_v7 = vpop.eup %650  ;;  %v350_v8 = vmul.f32 %v649_v4, %v222_v63  ;;  %676 = vrcp.f32 %v316_v3 }
  0x5c   : > { %v653_v10 = vpop.eup %652  ;;  %365 = vst [vmem:[%s990_s21] sm:$0xff] %v349_v5  ;;  %v351_v11 = vmul.f32 %v651_v7, %v223_v2 }
  0x5d   : > { %v655_v13 = vpop.eup %654  ;;  %366 = vst [vmem:[%s990_s21 + $0x8] sm:$0xff] %v350_v8  ;;  %v352_v14 = vmul.f32 %v653_v10, %v224_v6 }
  0x5e   : > { %v657_v16 = vpop.eup %656  ;;  %367 = vst [vmem:[%s990_s21 + $0x10] sm:$0xff] %v351_v11  ;;  %v353_v17 = vmul.f32 %v655_v13, %v225_v9 }
  0x5f   : > { %v659_v19 = vpop.eup %658  ;;  %368 = vst [vmem:[%s990_s21 + $0x18] sm:$0xff] %v352_v14  ;;  %v354_v20 = vmul.f32 %v657_v16, %v226_v12 }
  0x60   : > { %v661_v22 = vpop.eup %660  ;;  %369 = vst [vmem:[%s990_s21 + $0x20] sm:$0xff] %v353_v17  ;;  %v355_v23 = vmul.f32 %v659_v19, %v227_v15 }
  0x61   : > { %v663_v25 = vpop.eup %662  ;;  %370 = vst [vmem:[%s990_s21 + $0x28] sm:$0xff] %v354_v20  ;;  %v356_v26 = vmul.f32 %v661_v22, %v228_v18 }
  0x62   : > { %v665_v28 = vpop.eup %664  ;;  %371 = vst [vmem:[%s990_s21 + $0x30] sm:$0xff] %v355_v23  ;;  %v357_v29 = vmul.f32 %v663_v25, %v229_v21 }
  0x63   : > { %v667_v31 = vpop.eup %666  ;;  %372 = vst [vmem:[%s990_s21 + $0x38] sm:$0xff] %v356_v26  ;;  %v358_v32 = vmul.f32 %v665_v28, %v230_v24 }
  0x64   : > { %v669_v34 = vpop.eup %668  ;;  %373 = vst [vmem:[%s990_s21 + $0x40] sm:$0xff] %v357_v29  ;;  %v359_v35 = vmul.f32 %v667_v31, %v231_v27 }
  0x65   : > { %v671_v37 = vpop.eup %670  ;;  %374 = vst [vmem:[%s990_s21 + $0x48] sm:$0xff] %v358_v32  ;;  %v360_v38 = vmul.f32 %v669_v34, %v232_v30 }
  0x66   : > { %v673_v40 = vpop.eup %672  ;;  %375 = vst [vmem:[%s990_s21 + $0x50] sm:$0xff] %v359_v35  ;;  %v361_v41 = vmul.f32 %v671_v37, %v233_v33 }
  0x67   : > { %v675_v43 = vpop.eup %674  ;;  %376 = vst [vmem:[%s990_s21 + $0x58] sm:$0xff] %v360_v38  ;;  %v362_v44 = vmul.f32 %v673_v40, %v234_v36 }
  0x68   : > { %v677_v45 = vpop.eup %676  ;;  %377 = vst [vmem:[%s990_s21 + $0x60] sm:$0xff] %v361_v41  ;;  %v363_v46 = vmul.f32 %v675_v43, %v235_v39 }
  0x69   : > { %378 = vst [vmem:[%s990_s21 + $0x68] sm:$0xff] %v362_v44  ;;  %v364_v47 = vmul.f32 %v677_v45, %v236_v42 }
  0x6a   : > { %379 = vst [vmem:[%s990_s21 + $0x70] sm:$0xff] %v363_v46 }
  0x6b   : > { %380 = vst [vmem:[%s990_s21 + $0x78] sm:$0xff] %v364_v47 }
  0x6c   : > { %748 = shalt.err (!%p745_p6)
}
  0x6d   : > { %s749_s4 = scalar_lea.hbm %s1022_s3, 2048  ;;  %s753_s26 = scalar_lea.hbm %s1068_s2, 4096 }
  0x6e   : > { %p750_p7 = scmp.ne.s32.totalorder %s1022_s3, %s749_s4  ;;  %p754_p4 = scmp.lt.s32.totalorder %s1022_s3, %s1068_s2 }
  0x6f   : > { %p755_p10 = scmp.lt.s32.totalorder %s753_s26, %s749_s4 }
  0x70   : > { %p751_p1 = pnand %p750_p7, %p890_p9 }
  0x71   : > { %p756_p8 = por %p755_p10, %p754_p4 }
  0x72   : > { %p752_p2 = pneg %p751_p1 }
  0x74   : > { %p757_p0 = pnand %p756_p8, %p752_p2 }
  0x76   : > { %760 = shalt.err (!%p757_p0)
}
  0x77   : > { %551 = dma.vmem_to_hbm [thread:$0]  (%p890_p9), %s399_s20, 2048, %s1022_s3, %s382_s7  }
  0x78 PF: > { %s410_s5 = sand.u32 1, %s799_s9   ;;  %p1075_p3 = scmp.ge.s32.totalorder %s819_s14, 2 }
  0x79   : > { %s411_s18 = scalar_lea.sflag [#allocation4], %s410_s5 }
  0x7a   : > { %p561_p13 = pnand %p1075_p3, %p897_p11 }
  0x7c   : > { %p562_p5 = pneg %p561_p13 }
  0x7e   : > { %794 = dma.done.wait (%p562_p5), %s411_s18, 2048  }
  0x7f   : > { %796 = vsyncadd (%p562_p5), %s411_s18, 4294965248  ;;  %s21_s14 = sadd.s32 1, %s819_s14   ;;  %s1076_s9 = smov %s803_s10 }
  0x80   : > { %p18_p12 = scmp.ge.s32.totalorder %s21_s14, 4   ;;  %s1077_s10 = smov %s807_s11 }
  0x81   : > { %s1078_s11 = smov %s895_s23  ;;  %s1079_s12 = smov %s815_s13 }
  0x82   : > { %s1080_s13 = smov %s1082_s17  ;;  %20 = sbr.rel (!%p18_p12) target bundleno = 8 (0x8), region = 86 }
  0x87   :  { %416 = vsyncpa [#allocation3], 1 }
  0x88   :  { %418 = vsyncpa [#allocation3 + $0x1], 1 }
  0x89   :  { %419 = vsyncpa [#allocation6], 1 }
  0x8a   :  { %421 = vsyncpa [#allocation6 + $0x1], 1 }
  0x8b   :  { %422 = vsyncpa [#allocation4], 1 }
  0x8c   :  { %424 = vsyncpa [#allocation4 + $0x1], 1 }

</bundles_post_ra>
